<compile_context>
chip_gen: v6e
topology: v6e:2x2x1
jax: 0.10.0
libtpu: 0.0.40
codegen_flags: <defaults>
</compile_context>

<pallas_src>
import jax
import jax.numpy as jnp
from jax.experimental import pallas as pl
from jax.experimental.pallas import tpu as pltpu

_LANE = 128
_SUBLANE = 8
_MIN_TILE_S = 32      # satisfies (8,128)/(16,128)/(32,128) min tiles: f32/bf16/int8


def _make_jaccard_kernel(n_classes, tile_s, kp, n_pixels, needs_mask):
    C = n_classes
    G = tile_s // _SUBLANE          # tile_s is a multiple of 32

    def kernel(x_ref, t_ref, inter_ref, union_ref):
        # x_ref:     (1, C, tile_s, 128)  logits, native dtype (f32 / bf16)
        # t_ref:     (1, 1, tile_s, 128)  labels, int8 (int32 if C > 127)
        # inter_ref: (1, 1, C, 8, 128)    f32 sublane+lane partials (VMEM-resident)
        # union_ref: (1, 1, C, 8, 128)    f32 sublane+lane partials (VMEM-resident)
        k = pl.program_id(2)

        @pl.when(k == 0)
        def _init():
            inter_ref[...] = jnp.zeros_like(inter_ref)
            union_ref[...] = jnp.zeros_like(union_ref)

        t = t_ref[0, 0].astype(jnp.int32)          # widen int8 labels once

        if needs_mask:
            # Global pixel index of every element of this (tile_s, 128) tile;
            # kills the ragged tail / duplicated remainder tiles that were
            # never padded in HBM (and sanitizes any stale OOB garbage,
            # including NaN/Inf in the logit planes).
            j = pl.program_id(1) * kp + k          # un-clamped logical tile id
            row = jax.lax.broadcasted_iota(jnp.int32, (tile_s, _LANE), 0)
            lane = jax.lax.broadcasted_iota(jnp.int32, (tile_s, _LANE), 1)
            pix = (j * tile_s + row) * _LANE + lane
            valid = pix < n_pixels
            valid_f = valid.astype(jnp.float32)

        def load_plane(c):
            xc = x_ref[0, c].astype(jnp.float32)   # per-plane upcast (bf16 path)
            if needs_mask:
                xc = jnp.where(valid, xc, 0.0)     # sanitize OOB garbage
            return xc

        # Numerically stable softmax across the C fully-packed class planes:
        # pure elementwise VPU/EUP work, no cross-sublane reduce.  Planes are
        # re-loaded from VMEM (a vld, not a DMA) instead of kept live, to cap
        # in-kernel temporaries at ~C planes for the v7x 64 MiB VMEM budget.
        m = load_plane(0)
        for c in range(1, C):
            m = jnp.maximum(m, load_plane(c))
        es = []
        denom = None
        for c in range(C):
            e = jnp.exp(load_plane(c) - m)
            es.append(e)
            denom = e if denom is None else denom + e
        # Exact reciprocal keeps the 1e-5 tolerance; the kernel is HBM-bound,
        # so the extra VALU ops are hidden.  (Switch to approx=True plus one
        # Newton step only if a bundle dump shows the VALU slot binding.)
        inv = pl.reciprocal(denom, approx=False)
        if needs_mask:
            inv = inv * valid_f                    # zero out invalid pixels

        def sublane_partial(v):                    # (tile_s, 128) -> (8, 128)
            # Groups of 8 sublanes = whole vregs: pure VPU adds, no XLU.
            return jnp.sum(v.reshape(G, _SUBLANE, _LANE), axis=0)

        # Per class: inter = sum(p * [t == c]); union = sum(p) + count - inter.
        # Accumulate whole (8,128) vregs per class -- no concat, no masked
        # sub-vreg read-modify-write stores; the 8->1 and 128->1 reductions
        # happen once in the JAX glue.
        for c in range(C):
            p_c = es[c] * inv
            hit = t == c
            if needs_mask:
                hit = jnp.logical_and(hit, valid)
            hit_f = hit.astype(jnp.float32)
            inter_p = sublane_partial(p_c * hit_f)
            sum_p = sublane_partial(p_c)
            cnt_p = sublane_partial(hit_f)
            inter_ref[0, 0, c] = inter_ref[0, 0, c] + inter_p
            union_ref[0, 0, c] = union_ref[0, 0, c] + (sum_p + cnt_p - inter_p)

    return kernel


def jaccard_loss(inputs, target, n_classes=2, *, tile_s=None):
    """Pallas-backed Jaccard loss.

    inputs: (N, C, H, W) float logits; target: (N, H, W) int class indices.
    """
    N, C, H, W = inputs.shape
    assert C == n_classes
    HW = H * W

    # ---- dtype transport: native logits (bf16-capable), int8 labels ----
    if inputs.dtype in (jnp.float32, jnp.bfloat16):
        x = inputs
    else:
        x = inputs.astype(jnp.float32)
    x_itemsize = jnp.dtype(x.dtype).itemsize
    t_dtype = jnp.int8 if n_classes <= 127 else jnp.int32
    t = target.astype(t_dtype)
    t_itemsize = jnp.dtype(t_dtype).itemsize

    # ---- pixel layout: (S, 128) lane-dense slabs ----
    s_needed = -(-HW // _LANE)                    # ceil(HW / 128)
    S = max(_MIN_TILE_S, s_needed)                # >= 32 so every dtype's min tile fits

    # ---- tile size: biggest multiple of 32 fitting a ~24 MiB working set ----
    # Working set per row of tile_s: 2-deep pipelined (x, t) input blocks plus
    # ~(C + 4) live f32 temporary planes (exp planes, max, denom, mask).
    bytes_per_row = (2 * (C * x_itemsize + t_itemsize) * _LANE
                     + (C + 4) * 4 * _LANE)
    if tile_s is None:
        budget = 24 * 1024 * 1024
        tile_s = (budget // bytes_per_row) // _MIN_TILE_S * _MIN_TILE_S
    tile_s = int(tile_s) // _MIN_TILE_S * _MIN_TILE_S
    tile_s = max(_MIN_TILE_S, min(2048, tile_s))
    tile_s = min(tile_s, (S // _MIN_TILE_S) * _MIN_TILE_S)

    num_k = -(-S // tile_s)

    # ---- v7x: give the second TensorCore work when the batch axis is small ----
    core_split = 2 if (N < 4 and num_k >= 2) else 1
    kp = -(-num_k // core_split)

    covered = core_split * kp * tile_s * _LANE
    needs_mask = covered != HW                    # ragged tail / remainder tiles

    # ---- reshape; pad only if HW is not a multiple of 128 (or image is tiny) ----
    x = x.reshape(N, C, HW)
    t = t.reshape(N, 1, HW)
    if S * _LANE != HW:
        # Only hit when HW % 128 != 0 or HW < 4096; common segmentation sizes
        # (e.g. 256x256, 512x512) skip this extra HBM pass entirely.
        x = jnp.pad(x, ((0, 0), (0, 0), (0, S * _LANE - HW)))
        t = jnp.pad(t, ((0, 0), (0, 0), (0, S * _LANE - HW)))
    x = x.reshape(N, C, S, _LANE)
    t = t.reshape(N, 1, S, _LANE)

    if core_split * kp == num_k:
        def j_of(p, k):                           # exact cover, no clamp needed
            return p * kp + k
    else:
        def j_of(p, k):                           # never fetch a fully-OOB block;
            return jnp.minimum(p * kp + k, num_k - 1)   # duplicates are masked out

    grid = (N, core_split, kp)

    inter_p, union_p = pl.pallas_call(
        _make_jaccard_kernel(C, tile_s, kp, HW, needs_mask),
        grid=grid,
        in_specs=[
            pl.BlockSpec((1, C, tile_s, _LANE), lambda n, p, k: (n, 0, j_of(p, k), 0)),
            pl.BlockSpec((1, 1, tile_s, _LANE), lambda n, p, k: (n, 0, j_of(p, k), 0)),
        ],
        out_specs=[
            pl.BlockSpec((1, 1, C, _SUBLANE, _LANE), lambda n, p, k: (n, p, 0, 0, 0)),
            pl.BlockSpec((1, 1, C, _SUBLANE, _LANE), lambda n, p, k: (n, p, 0, 0, 0)),
        ],
        out_shape=[
            jax.ShapeDtypeStruct((N, core_split, C, _SUBLANE, _LANE), jnp.float32),
            jax.ShapeDtypeStruct((N, core_split, C, _SUBLANE, _LANE), jnp.float32),
        ],
        compiler_params=pltpu.CompilerParams(
            dimension_semantics=("parallel", "parallel", "arbitrary"),
            # Covers double-buffered inputs + in-kernel f32 temporaries with
            # headroom below v7x's 64 MiB physical VMEM.
            vmem_limit_bytes=48 * 1024 * 1024),
    )(x, t)

    # Tiny final reductions (N*P*C*8*128 elements) kept in plain JAX glue.
    inter = inter_p.sum(axis=(1, 3, 4))   # (N, C)
    union = union_p.sum(axis=(1, 3, 4))   # (N, C)
    return 1.0 - jnp.mean(inter / union)


def _jaccard_loss_ref(inputs, target, n_classes=2):
    """Pure-JAX reference mirroring the PyTorch module exactly."""
    N, C, H, W = inputs.shape
    p = jax.nn.softmax(inputs.astype(jnp.float32), axis=1)
    onehot = jax.nn.one_hot(target, n_classes, axis=1, dtype=jnp.float32)
    inter = (p * onehot).reshape(N, C, -1).sum(axis=2)
    union = (p + onehot - p * onehot).reshape(N, C, -1).sum(axis=2)
    return 1.0 - jnp.mean(inter / union)


if __name__ == "__main__":
    key = jax.random.PRNGKey(0)
    keys = jax.random.split(key, 8)

    # Case 1: module default (n_classes=2), tiny image -> exercises the
    # small-image pad + in-kernel mask path (single reduction step).
    N, C, H, W = 2, 2, 16, 16
    x1 = jax.random.normal(keys[0], (N, C, H, W), dtype=jnp.float32)
    t1 = jax.random.randint(keys[1], (N, H, W), 0, C, dtype=jnp.int32)
    out1 = jax.block_until_ready(jaccard_loss(x1, t1, n_classes=C))
    ref1 = jax.block_until_ready(_jaccard_loss_ref(x1, t1, n_classes=C))
    assert jnp.allclose(out1, ref1, atol=1e-5, rtol=1e-5), (out1, ref1)

    # Case 2: 4 classes, forced small tile -> multi-step reduction + pixel-axis
    # core split with exact coverage (no pad, no mask, no index clamp).
    N, C, H, W = 2, 4, 128, 128
    x2 = jax.random.normal(keys[2], (N, C, H, W), dtype=jnp.float32)
    t2 = jax.random.randint(keys[3], (N, H, W), 0, C, dtype=jnp.int32)
    out2 = jax.block_until_ready(jaccard_loss(x2, t2, n_classes=C, tile_s=32))
    ref2 = jax.block_until_ready(_jaccard_loss_ref(x2, t2, n_classes=C))
    assert jnp.allclose(out2, ref2, atol=1e-5, rtol=1e-5), (out2, ref2)

    # Case 3: bf16 logits, HW a multiple of 128 but not of the tile span ->
    # native-dtype transport, no HBM pad, ragged tail masked in-kernel.
    N, C, H, W = 1, 3, 96, 80
    x3 = jax.random.normal(keys[4], (N, C, H, W), dtype=jnp.bfloat16)
    t3 = jax.random.randint(keys[5], (N, H, W), 0, C, dtype=jnp.int32)
    out3 = jax.block_until_ready(jaccard_loss(x3, t3, n_classes=C))
    ref3 = jax.block_until_ready(_jaccard_loss_ref(x3, t3, n_classes=C))
    assert jnp.allclose(out3, ref3, atol=2e-5, rtol=2e-5), (out3, ref3)

    # Case 4: odd number of pixel tiles with the core split -> exercises the
    # clamped index_map + fully-masked duplicate-tile path.
    N, C, H, W = 1, 2, 96, 128
    x4 = jax.random.normal(keys[6], (N, C, H, W), dtype=jnp.float32)
    t4 = jax.random.randint(keys[7], (N, H, W), 0, C, dtype=jnp.int32)
    out4 = jax.block_until_ready(jaccard_loss(x4, t4, n_classes=C, tile_s=32))
    ref4 = jax.block_until_ready(_jaccard_loss_ref(x4, t4, n_classes=C))
    assert jnp.allclose(out4, ref4, atol=1e-5, rtol=1e-5), (out4, ref4)

    print("KERNEL_OK")
</pallas_src>

<mosaic_0001>
module attributes {stable_mosaic.version = 11 : i64} {
  func.func @kernel(%arg0: i32, %arg1: i32, %arg2: i32, %arg3: memref<1x2x32x128xf32, #tpu.memory_space<vmem>>, %arg4: memref<1x1x32x128xi8, #tpu.memory_space<vmem>>, %arg5: memref<1x1x2x8x128xf32, #tpu.memory_space<vmem>>, %arg6: memref<1x1x2x8x128xf32, #tpu.memory_space<vmem>>) attributes {dimension_semantics = [#tpu.dimension_semantics<parallel>, #tpu.dimension_semantics<parallel>, #tpu.dimension_semantics<arbitrary>], iteration_bounds = array<i64: 2, 1, 1>, scalar_prefetch = 0 : i64, scratch_operands = 0 : i64, tpu.core_type = #tpu.core_type<tc>, window_params = [{transform_indices = @transform_0, window_bounds = array<i64: 1, 2, 32, 128>}, {transform_indices = @transform_1, window_bounds = array<i64: 1, 1, 32, 128>}, {transform_indices = @transform_2, window_bounds = array<i64: 1, 1, 2, 8, 128>}, {transform_indices = @transform_3, window_bounds = array<i64: 1, 1, 2, 8, 128>}]} {
    %c0_i32 = arith.constant 0 : i32
    %0 = arith.cmpi eq, %arg2, %c0_i32 : i32
    %1 = arith.extui %0 : i1 to i32
    %c0_i32_0 = arith.constant 0 : i32
    %2 = arith.cmpi ne, %1, %c0_i32_0 : i32
    scf.if %2 {
      %cst_70 = arith.constant 0.000000e+00 : f32
      %98 = vector.broadcast %cst_70 : f32 to vector<1x1x2x8x128xf32>
      %c0_71 = arith.constant 0 : index
      %c0_72 = arith.constant 0 : index
      %c0_73 = arith.constant 0 : index
      %c0_74 = arith.constant 0 : index
      %c0_75 = arith.constant 0 : index
      %99 = vector.load %arg5[%c0_71, %c0_72, %c0_73, %c0_74, %c0_75] : memref<1x1x2x8x128xf32, #tpu.memory_space<vmem>>, vector<1x1x2x8x128xf32>
      tpu.vector_store %arg5[%c0_71, %c0_72, %c0_73, %c0_74, %c0_75], %98 {strides = array<i32>} : memref<1x1x2x8x128xf32, #tpu.memory_space<vmem>>, vector<1x1x2x8x128xf32>,
      %cst_76 = arith.constant 0.000000e+00 : f32
      %100 = vector.broadcast %cst_76 : f32 to vector<1x1x2x8x128xf32>
      %c0_77 = arith.constant 0 : index
      %c0_78 = arith.constant 0 : index
      %c0_79 = arith.constant 0 : index
      %c0_80 = arith.constant 0 : index
      %c0_81 = arith.constant 0 : index
      %101 = vector.load %arg6[%c0_77, %c0_78, %c0_79, %c0_80, %c0_81] : memref<1x1x2x8x128xf32, #tpu.memory_space<vmem>>, vector<1x1x2x8x128xf32>
      tpu.vector_store %arg6[%c0_77, %c0_78, %c0_79, %c0_80, %c0_81], %100 {strides = array<i32>} : memref<1x1x2x8x128xf32, #tpu.memory_space<vmem>>, vector<1x1x2x8x128xf32>,
    } else {
    }
    %c0 = arith.constant 0 : index
    %c0_1 = arith.constant 0 : index
    %c0_2 = arith.constant 0 : index
    %c0_3 = arith.constant 0 : index
    %3 = vector.load %arg4[%c0, %c0_1, %c0_2, %c0_3] : memref<1x1x32x128xi8, #tpu.memory_space<vmem>>, vector<1x1x32x128xi8>
    %4 = vector.shape_cast %3 : vector<1x1x32x128xi8> to vector<32x128xi8>
    %5 = arith.extsi %4 : vector<32x128xi8> to vector<32x128xi32>
    %c1_i32 = arith.constant 1 : i32
    %6 = arith.muli %arg1, %c1_i32 : i32
    %7 = arith.addi %6, %arg2 : i32
    %8 = tpu.iota {dimensions = array<i32: 0>} : vector<32x128xi32>
    %9 = tpu.iota {dimensions = array<i32: 1>} : vector<32x128xi32>
    %c32_i32 = arith.constant 32 : i32
    %10 = arith.muli %7, %c32_i32 : i32
    %11 = vector.broadcast %10 : i32 to vector<32x128xi32>
    %12 = arith.addi %11, %8 : vector<32x128xi32>
    %c128_i32 = arith.constant 128 : i32
    %13 = vector.broadcast %c128_i32 : i32 to vector<32x128xi32>
    %14 = arith.muli %12, %13 : vector<32x128xi32>
    %15 = arith.addi %14, %9 : vector<32x128xi32>
    %c256_i32 = arith.constant 256 : i32
    %16 = vector.broadcast %c256_i32 : i32 to vector<32x128xi32>
    %17 = arith.cmpi slt, %15, %16 : vector<32x128xi32>
    %18 = arith.extui %17 : vector<32x128xi1> to vector<32x128xi32>
    %19 = arith.sitofp %18 : vector<32x128xi32> to vector<32x128xf32>
    %c0_4 = arith.constant 0 : index
    %c0_5 = arith.constant 0 : index
    %c0_6 = arith.constant 0 : index
    %c0_7 = arith.constant 0 : index
    %20 = vector.load %arg3[%c0_4, %c0_5, %c0_6, %c0_7] : memref<1x2x32x128xf32, #tpu.memory_space<vmem>>, vector<1x1x32x128xf32>
    %21 = vector.shape_cast %20 : vector<1x1x32x128xf32> to vector<32x128xf32>
    %cst = arith.constant 0.000000e+00 : f32
    %22 = vector.broadcast %cst : f32 to vector<32x128xf32>
    %23 = arith.select %17, %21, %22 : vector<32x128xi1>, vector<32x128xf32>
    %c0_8 = arith.constant 0 : index
    %c1 = arith.constant 1 : index
    %c0_9 = arith.constant 0 : index
    %c0_10 = arith.constant 0 : index
    %24 = vector.load %arg3[%c0_8, %c1, %c0_9, %c0_10] : memref<1x2x32x128xf32, #tpu.memory_space<vmem>>, vector<1x1x32x128xf32>
    %25 = vector.shape_cast %24 : vector<1x1x32x128xf32> to vector<32x128xf32>
    %cst_11 = arith.constant 0.000000e+00 : f32
    %26 = vector.broadcast %cst_11 : f32 to vector<32x128xf32>
    %27 = arith.select %17, %25, %26 : vector<32x128xi1>, vector<32x128xf32>
    %28 = arith.maximumf %23, %27 : vector<32x128xf32>
    %c0_12 = arith.constant 0 : index
    %c0_13 = arith.constant 0 : index
    %c0_14 = arith.constant 0 : index
    %c0_15 = arith.constant 0 : index
    %29 = vector.load %arg3[%c0_12, %c0_13, %c0_14, %c0_15] : memref<1x2x32x128xf32, #tpu.memory_space<vmem>>, vector<1x1x32x128xf32>
    %30 = vector.shape_cast %29 : vector<1x1x32x128xf32> to vector<32x128xf32>
    %cst_16 = arith.constant 0.000000e+00 : f32
    %31 = vector.broadcast %cst_16 : f32 to vector<32x128xf32>
    %32 = arith.select %17, %30, %31 : vector<32x128xi1>, vector<32x128xf32>
    %33 = arith.subf %32, %28 : vector<32x128xf32>
    %34 = math.exp %33 : vector<32x128xf32>
    %c0_17 = arith.constant 0 : index
    %c1_18 = arith.constant 1 : index
    %c0_19 = arith.constant 0 : index
    %c0_20 = arith.constant 0 : index
    %35 = vector.load %arg3[%c0_17, %c1_18, %c0_19, %c0_20] : memref<1x2x32x128xf32, #tpu.memory_space<vmem>>, vector<1x1x32x128xf32>
    %36 = vector.shape_cast %35 : vector<1x1x32x128xf32> to vector<32x128xf32>
    %cst_21 = arith.constant 0.000000e+00 : f32
    %37 = vector.broadcast %cst_21 : f32 to vector<32x128xf32>
    %38 = arith.select %17, %36, %37 : vector<32x128xi1>, vector<32x128xf32>
    %39 = arith.subf %38, %28 : vector<32x128xf32>
    %40 = math.exp %39 : vector<32x128xf32>
    %41 = arith.addf %34, %40 : vector<32x128xf32>
    %42 = tpu.reciprocal %41 : vector<32x128xf32> -> vector<32x128xf32>
    %43 = arith.mulf %42, %19 : vector<32x128xf32>
    %44 = arith.mulf %34, %43 : vector<32x128xf32>
    %c0_i32_22 = arith.constant 0 : i32
    %45 = vector.broadcast %c0_i32_22 : i32 to vector<32x128xi32>
    %46 = arith.cmpi eq, %5, %45 : vector<32x128xi32>
    %47 = arith.andi %46, %17 : vector<32x128xi1>
    %48 = arith.extui %47 : vector<32x128xi1> to vector<32x128xi32>
    %49 = arith.sitofp %48 : vector<32x128xi32> to vector<32x128xf32>
    %50 = arith.mulf %44, %49 : vector<32x128xf32>
    %51 = vector.shape_cast %50 : vector<32x128xf32> to vector<4x8x128xf32>
    %cst_23 = arith.constant dense<0.000000e+00> : vector<8x128xf32>
    %52 = vector.multi_reduction <add>, %51, %cst_23 [0] : vector<4x8x128xf32> to vector<8x128xf32>
    %53 = vector.shape_cast %44 : vector<32x128xf32> to vector<4x8x128xf32>
    %cst_24 = arith.constant dense<0.000000e+00> : vector<8x128xf32>
    %54 = vector.multi_reduction <add>, %53, %cst_24 [0] : vector<4x8x128xf32> to vector<8x128xf32>
    %55 = vector.shape_cast %49 : vector<32x128xf32> to vector<4x8x128xf32>
    %cst_25 = arith.constant dense<0.000000e+00> : vector<8x128xf32>
    %56 = vector.multi_reduction <add>, %55, %cst_25 [0] : vector<4x8x128xf32> to vector<8x128xf32>
    %c0_26 = arith.constant 0 : index
    %c0_27 = arith.constant 0 : index
    %c0_28 = arith.constant 0 : index
    %c0_29 = arith.constant 0 : index
    %c0_30 = arith.constant 0 : index
    %57 = vector.load %arg5[%c0_26, %c0_27, %c0_28, %c0_29, %c0_30] : memref<1x1x2x8x128xf32, #tpu.memory_space<vmem>>, vector<1x1x1x8x128xf32>
    %58 = vector.shape_cast %57 : vector<1x1x1x8x128xf32> to vector<8x128xf32>
    %59 = arith.addf %58, %52 : vector<8x128xf32>
    %c0_31 = arith.constant 0 : index
    %c0_32 = arith.constant 0 : index
    %c0_33 = arith.constant 0 : index
    %c0_34 = arith.constant 0 : index
    %c0_35 = arith.constant 0 : index
    %60 = vector.load %arg5[%c0_31, %c0_32, %c0_33, %c0_34, %c0_35] : memref<1x1x2x8x128xf32, #tpu.memory_space<vmem>>, vector<1x1x1x8x128xf32>
    %61 = vector.shape_cast %60 : vector<1x1x1x8x128xf32> to vector<8x128xf32>
    %62 = vector.shape_cast %59 : vector<8x128xf32> to vector<1x1x1x8x128xf32>
    tpu.vector_store %arg5[%c0_31, %c0_32, %c0_33, %c0_34, %c0_35], %62 {strides = array<i32>} : memref<1x1x2x8x128xf32, #tpu.memory_space<vmem>>, vector<1x1x1x8x128xf32>,
    %c0_36 = arith.constant 0 : index
    %c0_37 = arith.constant 0 : index
    %c0_38 = arith.constant 0 : index
    %c0_39 = arith.constant 0 : index
    %c0_40 = arith.constant 0 : index
    %63 = vector.load %arg6[%c0_36, %c0_37, %c0_38, %c0_39, %c0_40] : memref<1x1x2x8x128xf32, #tpu.memory_space<vmem>>, vector<1x1x1x8x128xf32>
    %64 = vector.shape_cast %63 : vector<1x1x1x8x128xf32> to vector<8x128xf32>
    %65 = arith.addf %54, %56 : vector<8x128xf32>
    %66 = arith.subf %65, %52 : vector<8x128xf32>
    %67 = arith.addf %64, %66 : vector<8x128xf32>
    %c0_41 = arith.constant 0 : index
    %c0_42 = arith.constant 0 : index
    %c0_43 = arith.constant 0 : index
    %c0_44 = arith.constant 0 : index
    %c0_45 = arith.constant 0 : index
    %68 = vector.load %arg6[%c0_41, %c0_42, %c0_43, %c0_44, %c0_45] : memref<1x1x2x8x128xf32, #tpu.memory_space<vmem>>, vector<1x1x1x8x128xf32>
    %69 = vector.shape_cast %68 : vector<1x1x1x8x128xf32> to vector<8x128xf32>
    %70 = vector.shape_cast %67 : vector<8x128xf32> to vector<1x1x1x8x128xf32>
    tpu.vector_store %arg6[%c0_41, %c0_42, %c0_43, %c0_44, %c0_45], %70 {strides = array<i32>} : memref<1x1x2x8x128xf32, #tpu.memory_space<vmem>>, vector<1x1x1x8x128xf32>,
    %71 = arith.mulf %40, %43 : vector<32x128xf32>
    %c1_i32_46 = arith.constant 1 : i32
    %72 = vector.broadcast %c1_i32_46 : i32 to vector<32x128xi32>
    %73 = arith.cmpi eq, %5, %72 : vector<32x128xi32>
    %74 = arith.andi %73, %17 : vector<32x128xi1>
    %75 = arith.extui %74 : vector<32x128xi1> to vector<32x128xi32>
    %76 = arith.sitofp %75 : vector<32x128xi32> to vector<32x128xf32>
    %77 = arith.mulf %71, %76 : vector<32x128xf32>
    %78 = vector.shape_cast %77 : vector<32x128xf32> to vector<4x8x128xf32>
    %cst_47 = arith.constant dense<0.000000e+00> : vector<8x128xf32>
    %79 = vector.multi_reduction <add>, %78, %cst_47 [0] : vector<4x8x128xf32> to vector<8x128xf32>
    %80 = vector.shape_cast %71 : vector<32x128xf32> to vector<4x8x128xf32>
    %cst_48 = arith.constant dense<0.000000e+00> : vector<8x128xf32>
    %81 = vector.multi_reduction <add>, %80, %cst_48 [0] : vector<4x8x128xf32> to vector<8x128xf32>
    %82 = vector.shape_cast %76 : vector<32x128xf32> to vector<4x8x128xf32>
    %cst_49 = arith.constant dense<0.000000e+00> : vector<8x128xf32>
    %83 = vector.multi_reduction <add>, %82, %cst_49 [0] : vector<4x8x128xf32> to vector<8x128xf32>
    %c0_50 = arith.constant 0 : index
    %c0_51 = arith.constant 0 : index
    %c1_52 = arith.constant 1 : index
    %c0_53 = arith.constant 0 : index
    %c0_54 = arith.constant 0 : index
    %84 = vector.load %arg5[%c0_50, %c0_51, %c1_52, %c0_53, %c0_54] : memref<1x1x2x8x128xf32, #tpu.memory_space<vmem>>, vector<1x1x1x8x128xf32>
    %85 = vector.shape_cast %84 : vector<1x1x1x8x128xf32> to vector<8x128xf32>
    %86 = arith.addf %85, %79 : vector<8x128xf32>
    %c0_55 = arith.constant 0 : index
    %c0_56 = arith.constant 0 : index
    %c1_57 = arith.constant 1 : index
    %c0_58 = arith.constant 0 : index
    %c0_59 = arith.constant 0 : index
    %87 = vector.load %arg5[%c0_55, %c0_56, %c1_57, %c0_58, %c0_59] : memref<1x1x2x8x128xf32, #tpu.memory_space<vmem>>, vector<1x1x1x8x128xf32>
    %88 = vector.shape_cast %87 : vector<1x1x1x8x128xf32> to vector<8x128xf32>
    %89 = vector.shape_cast %86 : vector<8x128xf32> to vector<1x1x1x8x128xf32>
    tpu.vector_store %arg5[%c0_55, %c0_56, %c1_57, %c0_58, %c0_59], %89 {strides = array<i32>} : memref<1x1x2x8x128xf32, #tpu.memory_space<vmem>>, vector<1x1x1x8x128xf32>,
    %c0_60 = arith.constant 0 : index
    %c0_61 = arith.constant 0 : index
    %c1_62 = arith.constant 1 : index
    %c0_63 = arith.constant 0 : index
    %c0_64 = arith.constant 0 : index
    %90 = vector.load %arg6[%c0_60, %c0_61, %c1_62, %c0_63, %c0_64] : memref<1x1x2x8x128xf32, #tpu.memory_space<vmem>>, vector<1x1x1x8x128xf32>
    %91 = vector.shape_cast %90 : vector<1x1x1x8x128xf32> to vector<8x128xf32>
    %92 = arith.addf %81, %83 : vector<8x128xf32>
    %93 = arith.subf %92, %79 : vector<8x128xf32>
    %94 = arith.addf %91, %93 : vector<8x128xf32>
    %c0_65 = arith.constant 0 : index
    %c0_66 = arith.constant 0 : index
    %c1_67 = arith.constant 1 : index
    %c0_68 = arith.constant 0 : index
    %c0_69 = arith.constant 0 : index
    %95 = vector.load %arg6[%c0_65, %c0_66, %c1_67, %c0_68, %c0_69] : memref<1x1x2x8x128xf32, #tpu.memory_space<vmem>>, vector<1x1x1x8x128xf32>
    %96 = vector.shape_cast %95 : vector<1x1x1x8x128xf32> to vector<8x128xf32>
    %97 = vector.shape_cast %94 : vector<8x128xf32> to vector<1x1x1x8x128xf32>
    tpu.vector_store %arg6[%c0_65, %c0_66, %c1_67, %c0_68, %c0_69], %97 {strides = array<i32>} : memref<1x1x2x8x128xf32, #tpu.memory_space<vmem>>, vector<1x1x1x8x128xf32>,
    return
  }
  func.func @transform_0(%arg0: i32, %arg1: i32, %arg2: i32) -> (i32, i32, i32, i32) {
    %c1_i32 = arith.constant 1 : i32
    %0 = arith.muli %arg1, %c1_i32 : i32
    %1 = arith.addi %0, %arg2 : i32
    %c0_i32 = arith.constant 0 : i32
    %c0_i32_0 = arith.constant 0 : i32
    %c0_i32_1 = arith.constant 0 : i32
    return %arg0, %c0_i32, %1, %c0_i32_0 : i32, i32, i32, i32
  }
  func.func @transform_1(%arg0: i32, %arg1: i32, %arg2: i32) -> (i32, i32, i32, i32) {
    %c1_i32 = arith.constant 1 : i32
    %0 = arith.muli %arg1, %c1_i32 : i32
    %1 = arith.addi %0, %arg2 : i32
    %c0_i32 = arith.constant 0 : i32
    %c0_i32_0 = arith.constant 0 : i32
    %c0_i32_1 = arith.constant 0 : i32
    return %arg0, %c0_i32, %1, %c0_i32_0 : i32, i32, i32, i32
  }
  func.func @transform_2(%arg0: i32, %arg1: i32, %arg2: i32) -> (i32, i32, i32, i32, i32) {
    %c0_i32 = arith.constant 0 : i32
    %c0_i32_0 = arith.constant 0 : i32
    %c0_i32_1 = arith.constant 0 : i32
    %c0_i32_2 = arith.constant 0 : i32
    return %arg0, %arg1, %c0_i32, %c0_i32_0, %c0_i32_1 : i32, i32, i32, i32, i32
  }
  func.func @transform_3(%arg0: i32, %arg1: i32, %arg2: i32) -> (i32, i32, i32, i32, i32) {
    %c0_i32 = arith.constant 0 : i32
    %c0_i32_0 = arith.constant 0 : i32
    %c0_i32_1 = arith.constant 0 : i32
    %c0_i32_2 = arith.constant 0 : i32
    return %arg0, %arg1, %c0_i32, %c0_i32_0, %c0_i32_1 : i32, i32, i32, i32, i32
  }
}

</mosaic_0001>

<bundles_post_ra>
// kernel: tpu_custom_call.1
= control target key start
LH: loop header
LB: loop body
LE: loop exit
PB: predicated region body
PF: predicated region fallthrough
CT: control target
= control target key end

     0   :  { %s1296_s0 = inlined_call_operand.hbm [shape: f32[2,2,32,128], index: 0, kind: input, shape index: {}]   ;;  %s1297_s1 = inlined_call_operand.hbm [shape: s8[2,1,32,128], index: 1, kind: input, shape index: {}]   ;;  %s1298_s2 = inlined_call_operand.hbm [shape: f32[2,1,2,8,128], index: 2, kind: output, shape index: {0}]   ;;  %s1299_s3 = inlined_call_operand.hbm [shape: f32[2,1,2,8,128], index: 3, kind: output, shape index: {1}]  }
   0x1   :  { %1300 = sst [smem:[#allocation14_spill]] %s1296_s0 }
   0x2   :  { %9 = vsyncpa [#allocation3], 0 }
   0x3   :  { %11 = vsyncpa [#allocation3 + $0x1], 0 }
   0x4   :  { %12 = vsyncpa [#allocation6], 0 }
   0x5   :  { %14 = vsyncpa [#allocation6 + $0x1], 0 }
   0x6   :  { %15 = vsyncpa [#allocation4], 0 }
   0x7   :  { %17 = vsyncpa [#allocation4 + $0x1], 0 }
   0x8   :  { %18 = vsyncpa [#allocation9], 0 }
   0x9   :  { %20 = vsyncpa [#allocation9 + $0x1], 0  ;;  %s1001_s12 = smov 0   ;;  %s1003_s13 = smov 0  }
   0xa   :  { %s1005_s14 = smov 0   ;;  %s1007_s15 = smov 0  }
   0xb   :  { %s1009_s16 = smov 0   ;;  %s1011_s17 = smov 0  }
   0xc LB: > { %s654_s18 = sadd.s32 4294967295, %s970_s17   ;;  %s655_s19 = sadd.s32 4294967294, %s970_s17   ;;  %s970_s17 = sphi %s1011_s17, %s26_s17   ;;  %s966_s16 = sphi %s1009_s16, %s1314_s16   ;;  %s962_s15 = sphi %s1007_s15, %s1313_s15   ;;  %s958_s14 = sphi %s1005_s14, %s1312_s14   ;;  %s954_s13 = sphi %s1003_s13, %s1311_s13   ;;  %s950_s12 = sphi %s1001_s12, %s1310_s12  }
   0xd   : > { %s45_s20 = sadd.s32 1, %s966_s16  ;;  %s56_s21 = sadd.s32 1, %s958_s14 }
   0xe   : > { %p47_p0 = scmp.ge.s32.totalorder %s45_s20, 2  ;;  %p63_p1 = scmp.ne.s32.totalorder %s958_s14, %s954_s13 }
   0xf   : > { %p64_p2 = scmp.eq.s32.totalorder %s970_s17, 0  ;;  %p69_p3 = scmp.ne.s32.totalorder %s954_s13, %s950_s12 }
  0x10   : > { %s1316_s20 = smov (%p47_p0, %s45_s20), 0  ;;  %p70_p5 = scmp.eq.s32.totalorder %s654_s18, 0 }
  0x11   : > { %p1042_p4 = por %p64_p2, %p63_p1  ;;  %s51_s23 = ssub.s32 %s966_s16, %s1316_s20 }
  0x12   : > { %p125_p6 = scmp.eq.s32.totalorder %s654_s18, 1  ;;  %p54_p7 = scmp.eq.s32.totalorder %s51_s23, 0 }
  0x13   : > { %p1048_p8 = por %p70_p5, %p69_p3  ;;  %p131_p10 = scmp.eq.s32.totalorder %s655_s19, 1 }
  0x14   : > { %p1052_p9 = por %p125_p6, %p63_p1  ;;  %p657_p12 = scmp.ge.s32.totalorder %s970_s17, 2 }
  0x15   : > { %s1057_s26 = scalar_select %p54_p7, %s958_s14, %s56_s21  }
  0x16   : > { %p1059_p11 = por %p131_p10, %p69_p3  ;;  %p721_p13 = scmp.lt.s32.totalorder %s970_s17, 2 }
  0x17   : > { %s1066_s28 = sand.u32 1, %s958_s14   ;;  %s696_s30 = sshll.u32 %s966_s16, 10 }
  0x18   : > { %s658_s29 = sshll.u32 %s1066_s28, 6  ;;  %s1305_s0 = sld [smem:[#allocation14_spill]] }
  0x19   : > { %s183_s7 = scalar_lea.vmem [#allocation2], %s658_s29  ;;  %p1075_p0 = pnand %p721_p13, %p1042_p4 }
  0x1a   : > { %s193_s8 = sshll.u32 %s183_s7, 4  ;;  %p663_p1 = scmp.ge.s32.totalorder %s970_s17, 1  ;;  %s194_s8 = int_to_ptr.vmem [resolvable:$true] %s193_s8 }
  0x1b   : > { %s180_s10 = scalar_lea.sflag [#allocation3], %s1066_s28  ;;  %p802_p2 = pneg %p1075_p0 }
  0x1c   : > { %s813_s11 = scalar_lea.vmem %s194_s8, 1024  ;;  %s972_s18 = smov [#allocation2]  }
  0x1d   : > { %p814_p3 = scmp.ne.s32.totalorder %s194_s8, %s813_s11  ;;  %s818_s19 = sshll.u32 %s972_s18, 4  ;;  %s819_s19 = int_to_ptr.vmem [resolvable:$false] %s818_s19 }
  0x1e   : > { %s192_s6 = scalar_lea.hbm %s1305_s0, %s696_s30  ;;  %s820_s21 = scalar_lea.vmem %s819_s19, 2048 }
  0x1f   : > { %p816_p5 = pnand %p814_p3, %p802_p2  ;;  %p821_p4 = scmp.lt.s32.totalorder %s194_s8, %s819_s19 }
  0x20   : > { %p822_p7 = scmp.lt.s32.totalorder %s820_s21, %s813_s11 }
  0x21   : > { %p817_p6 = pneg %p816_p5 }
  0x22   : > { %p823_p10 = por %p822_p7, %p821_p4 }
  0x24   : > { %p824_p13 = pnand %p823_p10, %p817_p6 }
  0x26   : > { %827 = shalt.err (!%p824_p13)
}
  0x27   : > { %s973_s22 = smov 128   ;;  %s974_s23 = smov 8  }
  0x28   : > { %710 = dma.hbm_to_vmem [thread:$0]  (!%p1075_p0), %s192_s6, 1024, %s194_s8, %s180_s10, %s973_s22, %s973_s22, %s974_s23  }
  0x29   : > { %p221_p3 = scmp.lt.s32.totalorder %s970_s17, 3  ;;  %s661_s29 = sshll.u32 %s1066_s28, 3 }
  0x2a   : > { %s662_s30 = sshll.u32 %s966_s16, 7  ;;  %s207_s18 = scalar_lea.vmem [#allocation5], %s661_s29 }
  0x2b   : > { %p1093_p5 = pnand %p663_p1, %p221_p3  ;;  %s214_s11 = scalar_lea.hbm %s1297_s1, %s662_s30 }
  0x2c   : > { %s216_s19 = sshll.u32 %s207_s18, 4  ;;  %s204_s21 = scalar_lea.sflag [#allocation6], %s1066_s28  ;;  %s217_s19 = int_to_ptr.vmem [resolvable:$true] %s216_s19 }
  0x2d   : > { %s841_s0 = scalar_lea.vmem %s217_s19, 128  ;;  %s975_s6 = smov [#allocation5]  }
  0x2e   : > { %p842_p6 = scmp.ne.s32.totalorder %s217_s19, %s841_s0  ;;  %s846_s8 = sshll.u32 %s975_s6, 4  ;;  %s847_s8 = int_to_ptr.vmem [resolvable:$false] %s846_s8 }
  0x2f   : > { %s848_s10 = scalar_lea.vmem %s847_s8, 256  ;;  %p849_p1 = scmp.lt.s32.totalorder %s217_s19, %s847_s8 }
  0x30   : > { %p844_p4 = pnand %p842_p6, %p802_p2  ;;  %p850_p10 = scmp.lt.s32.totalorder %s848_s10, %s841_s0 }
  0x32   : > { %p845_p7 = pneg %p844_p4  ;;  %p851_p13 = por %p850_p10, %p849_p1 }
  0x34   : > { %p852_p3 = pnand %p851_p13, %p845_p7 }
  0x36   : > { %855 = shalt.err (!%p852_p3)
}
  0x37   : > { %713 = dma.hbm_to_vmem [thread:$0]  (!%p1075_p0), %s214_s11, 128, %s217_s19, %s204_s21  }
  0x38   : > { %225 = sbr.rel (%p1093_p5) target bundleno = 167 (0xa7), region = 28  ;;  %s1109_s28 = sand.u32 (!%p1093_p5), 1, %s954_s13  }
  0x39   : > { %s664_s22 = sshll.u32 (!%p1093_p5), %s1109_s28, 6  ;;  %s228_s23 = scalar_lea.sflag (!%p1093_p5), [#allocation3], %s1109_s28 }
  0x3a   : > { %s1113_s29 = scalar_lea.vmem (!%p1093_p5), [#allocation2], %s664_s22 }
  0x3d   : > { %933 = dma.done.wait (%p1048_p8), %s228_s23, 1024  }
  0x3e   : > { %935 = vsyncadd (%p1048_p8), %s228_s23, 4294966272  ;;  %s665_s0 = sshll.u32 %s1109_s28, 3  ;;  %s237_s9 = scalar_lea.sflag [#allocation6], %s1109_s28 }
  0x3f   : > { %s1121_s30 = scalar_lea.vmem [#allocation5], %s665_s0 }
  0x40   : > { %937 = dma.done.wait (%p1048_p8), %s237_s9, 128  }
  0x41   : > { %939 = vsyncadd (%p1048_p8), %s237_s9, 4294967168  ;;  %v290_v0 = vlaneseq  ;;  %v323_v11 = vld [vmem:[%s1113_s29] sm:$0xff]  ;;  %v324_v16 = vld [vmem:[%s1113_s29 + $0x8] sm:$0xff]  ;;  %s666_s24 = sshll.u32 %s1109_s28, 4  ;;  %s697_s4 = sshll.u32 %s962_s15, 8 }
  0x42   : > { %v672_v12 = vld [vmem:[%s1113_s29 + $0x20] sm:$0xff]  ;;  %v325_v17 = vld [vmem:[%s1113_s29 + $0x10] sm:$0xff]  ;;  %v326_v18 = vld [vmem:[%s1113_s29 + $0x18] sm:$0xff]  ;;  %s265_s5 = scalar_lea.vmem [#allocation7], %s666_s24  ;;  %s1205_s19 = scalar_lea.hbm %s1298_s2, %s697_s4 }
  0x43   : > { %v291_v1 = vshrl.u32 %v290_v0, 7  ;;  %v296_v2 = vand.u32 127, %v290_v0  ;;  %v673_v20 = vld [vmem:[%s1113_s29 + $0x28] sm:$0xff]  ;;  %v674_v21 = vld [vmem:[%s1113_s29 + $0x30] sm:$0xff]  ;;  %v675_v23 = vld [vmem:[%s1113_s29 + $0x38] sm:$0xff]  ;;  %s485_s7 = sshll.u32 %s265_s5, 4  ;;  %s1217_s10 = scalar_lea.hbm %s1299_s3, %s697_s4  ;;  %s1207_s7 = int_to_ptr.vmem [resolvable:$true] %s485_s7 }
  0x44   : > { %v284_v53 = vld [vmem:[%s1121_s30] sm:$0xff]  ;;  %s1211_s15 = scalar_lea.vmem [#allocation8], %s666_s24  ;;  %s465_s22 = scalar_lea.sflag [#allocation4], %s1109_s28 }
  0x45   : > { %v292_v3 = vadd.s32 8, %v291_v1  ;;  %v293_v4 = vadd.s32 16, %v291_v1  ;;  %v294_v5 = vadd.s32 24, %v291_v1  ;;  %v303_v6 = vmul.u32 128, %v291_v1  ;;  %s503_s21 = sshll.u32 %s1211_s15, 4  ;;  %s856_s23 = scalar_lea.vmem %s1207_s7, 256  ;;  %s1219_s21 = int_to_ptr.vmem [resolvable:$true] %s503_s21 }
  0x46   : > { %v285_v58 = vunpack.c.0.s8 %v284_v53  ;;  %v286_v60 = vunpack.c.1.s8 %v284_v53  ;;  %v287_v1 = vunpack.c.2.s8 %v284_v53  ;;  %p857_p8 = scmp.ne.s32.totalorder %s1207_s7, %s856_s23  ;;  %s977_s29 = smov [#allocation7]  }
  0x47   : > { %v304_v7 = vmul.u32 128, %v292_v3  ;;  %v305_v8 = vmul.u32 128, %v293_v4  ;;  %v1127_v9 = vadd.s32 %v303_v6, %v296_v2  ;;  %v976_v3 = vmov 0.0   ;;  %s860_s0 = sshll.u32 %s977_s29, 4  ;;  %s861_s0 = int_to_ptr.vmem [resolvable:$false] %s860_s0 }
  0x48   : > { %v306_v10 = vmul.u32 128, %v294_v5  ;;  %vm384_vm4 = vcmp.eq.s32.totalorder %v285_v58, 0  ;;  %vm385_vm5 = vcmp.eq.s32.totalorder %v286_v60, 0  ;;  %vm425_vm6 = vcmp.eq.s32.totalorder %v285_v58, 1  ;;  %p858_p0 = pnand %p857_p8, %p1052_p9  ;;  %s862_s9 = scalar_lea.vmem %s861_s0, 512 }
  0x49   : > { %v1131_v13 = vadd.s32 %v304_v7, %v296_v2  ;;  %v1133_v14 = vadd.s32 %v305_v8, %v296_v2  ;;  %vm311_vm0 = vcmp.lt.s32.totalorder %v1127_v9, 256  ;;  %vm426_vm8 = vcmp.eq.s32.totalorder %v286_v60, 1  ;;  %p863_p5 = scmp.lt.s32.totalorder %s1207_s7, %s861_s0  ;;  %p864_p6 = scmp.lt.s32.totalorder %s862_s9, %s856_s23 }
  0x4a   : > { %v1135_v15 = vadd.s32 %v306_v10, %v296_v2  ;;  %v327_v19 = vsel %vm311_vm0, %v323_v11, 0.0  ;;  %v336_v22 = vsel %vm311_vm0, %v672_v12, 0.0  ;;  %v288_v2 = vunpack.c.3.s8 %v284_v53  ;;  %vm388_vm7 = vmand %vm384_vm4, %vm311_vm0  ;;  %p859_p2 = pneg %p858_p0 }
  0x4b   : > { %vm312_vm1 = vcmp.lt.s32.totalorder %v1131_v13, 256  ;;  %vm313_vm2 = vcmp.lt.s32.totalorder %v1133_v14, 256  ;;  %v340_v24 = vmax.f32 %v327_v19, %v336_v22  ;;  %vm386_vm10 = vcmp.eq.s32.totalorder %v287_v1, 0  ;;  %vm429_vm11 = vmand %vm425_vm6, %vm311_vm0  ;;  %p865_p4 = por %p864_p6, %p863_p5 }
  0x4c   : > { %vm314_vm3 = vcmp.lt.s32.totalorder %v1135_v15, 256  ;;  %v328_v25 = vsel %vm312_vm1, %v324_v16, 0.0  ;;  %v329_v26 = vsel %vm313_vm2, %v325_v17, 0.0  ;;  %v337_v28 = vsel %vm312_vm1, %v673_v20, 0.0  ;;  %vm389_vm9 = vmand %vm385_vm5, %vm312_vm1 }
  0x4d   : > { %v330_v27 = vsel %vm314_vm3, %v326_v18, 0.0  ;;  %v338_v29 = vsel %vm313_vm2, %v674_v21, 0.0  ;;  %v339_v30 = vsel %vm314_vm3, %v675_v23, 0.0  ;;  %v341_v31 = vmax.f32 %v328_v25, %v337_v28  ;;  %vm430_vm13 = vmand %vm426_vm8, %vm312_vm1  ;;  %p866_p7 = pnand %p865_p4, %p859_p2 }
  0x4e   : > { %v342_v32 = vmax.f32 %v329_v26, %v338_v29  ;;  %v344_v33 = vsub.f32 %v327_v19, %v340_v24  ;;  %v343_v34 = vmax.f32 %v330_v27, %v339_v30  ;;  %v356_v35 = vsub.f32 %v336_v22, %v340_v24  ;;  %vm390_vm15 = vmand %vm386_vm10, %vm313_vm2 }
  0x4f   : > { %v345_v36 = vsub.f32 %v328_v25, %v341_v31  ;;  %v357_v39 = vsub.f32 %v337_v28, %v341_v31  ;;  %v668_v4 = vsel %vm311_vm0, 1.0, %v976_v3  ;;  %vm387_vm12 = vcmp.eq.s32.totalorder %v288_v2, 0 }
  0x50   : > { %v346_v37 = vsub.f32 %v329_v26, %v342_v32  ;;  %v348_v38 = vmul.f32 1.442695, %v344_v33  ;;  %v347_v40 = vsub.f32 %v330_v27, %v343_v34  ;;  %v358_v41 = vsub.f32 %v338_v29, %v342_v32  ;;  %vm1181_vm5 = vmand %vm387_vm12, %vm314_vm3 }
  0x51   : > { %v359_v42 = vsub.f32 %v339_v30, %v343_v34  ;;  %v360_v43 = vmul.f32 1.442695, %v356_v35  ;;  %v350_v44 = vmul.f32 1.442695, %v345_v36  ;;  %v362_v47 = vmul.f32 1.442695, %v357_v39 }
  0x52   : > { %776 = vpow2.f32 %v348_v38  ;;  %v352_v45 = vmul.f32 1.442695, %v346_v37  ;;  %v354_v46 = vmul.f32 1.442695, %v347_v40  ;;  %v364_v48 = vmul.f32 1.442695, %v358_v41 }
  0x53   : > { %778 = vpow2.f32 %v360_v43  ;;  %v366_v49 = vmul.f32 1.442695, %v359_v42  ;;  %v676_v5 = vsel %vm388_vm7, 1.0, %v976_v3  ;;  %v677_v6 = vsel %vm389_vm9, 1.0, %v976_v3 }
  0x54   : > { %780 = vpow2.f32 %v350_v44  ;;  %vm427_vm14 = vcmp.eq.s32.totalorder %v287_v1, 1  ;;  %vm428_vm4 = vcmp.eq.s32.totalorder %v288_v2, 1  ;;  %v680_v9 = vsel %vm429_vm11, 1.0, %v976_v3 }
  0x55   : > { %782 = vpow2.f32 %v352_v45  ;;  %v681_v11 = vsel %vm430_vm13, 1.0, %v976_v3  ;;  %v669_v12 = vsel %vm312_vm1, 1.0, %v976_v3  ;;  %v410_v16 = vadd.f32 %v677_v6, %v676_v5  ;;  %vm431_vm0 = vmand %vm427_vm14, %vm313_vm2 }
  0x56   : > { %784 = vpow2.f32 %v354_v46  ;;  %v670_v17 = vsel %vm313_vm2, 1.0, %v976_v3  ;;  %v678_v19 = vsel %vm390_vm15, 1.0, %v976_v3  ;;  %vm432_vm6 = vmand %vm428_vm4, %vm314_vm3  ;;  %v671_v21 = vsel %vm314_vm3, 1.0, %v976_v3 }
  0x57   : > { %786 = vpow2.f32 %v362_v47  ;;  %v451_v13 = vadd.f32 %v681_v11, %v680_v9  ;;  %v682_v25 = vsel %vm431_vm0, 1.0, %v976_v3  ;;  %v679_v14 = vsel %vm1181_vm5, 1.0, %v976_v3 }
  0x58   : > { %788 = vpow2.f32 %v364_v48  ;;  %v411_v28 = vadd.f32 %v678_v19, %v410_v16  ;;  %v683_v29 = vsel %vm432_vm6, 1.0, %v976_v3 }
  0x59   : > { %790 = vpow2.f32 %v366_v49  ;;  %v452_v36 = vadd.f32 %v682_v25, %v451_v13 }
  0x5a   : > { %v412_v48 = vadd.f32 %v679_v14, %v411_v28 }
  0x5f   : > { %v777_v50 = vpop.eup %776 }
  0x60   : > { %v779_v51 = vpop.eup %778 }
  0x61   : > { %v781_v52 = vpop.eup %780  ;;  %v368_v54 = vadd.f32 %v779_v51, %v777_v50 }
  0x62   : > { %v783_v55 = vpop.eup %782 }
  0x63   : > { %v1164_v56 = vpop.eup %784  ;;  %792 = vrcp.f32 %v368_v54 }
  0x64   : > { %v787_v57 = vpop.eup %786 }
  0x65   : > { %v789_v59 = vpop.eup %788  ;;  %v369_v61 = vadd.f32 %v787_v57, %v781_v52 }
  0x66   : > { %v791_v62 = vpop.eup %790  ;;  %v370_v63 = vadd.f32 %v789_v59, %v783_v55 }
  0x67   : > { %v371_v0 = vadd.f32 %v791_v62, %v1164_v56  ;;  %794 = vrcp.f32 %v369_v61 }
  0x68   : > { %796 = vrcp.f32 %v370_v63 }
  0x69   : > { %798 = vrcp.f32 %v371_v0 }
  0x70   : > { %v793_v7 = vpop.eup %792 }
  0x71   : > { %v376_v8 = vmul.f32 %v793_v7, %v668_v4 }
  0x73   : > { %v380_v18 = vmul.f32 %v777_v50, %v376_v8  ;;  %v421_v22 = vmul.f32 %v779_v51, %v376_v8 }
  0x74   : > { %v795_v20 = vpop.eup %794 }
  0x75   : > { %v797_v23 = vpop.eup %796  ;;  %v377_v24 = vmul.f32 %v795_v20, %v669_v12  ;;  %v400_v32 = vmul.f32 %v676_v5, %v380_v18  ;;  %v441_v35 = vmul.f32 %v680_v9, %v421_v22 }
  0x76   : > { %v799_v26 = vpop.eup %798  ;;  %v378_v27 = vmul.f32 %v797_v23, %v670_v17 }
  0x77   : > { %v379_v30 = vmul.f32 %v799_v26, %v671_v21  ;;  %v381_v31 = vmul.f32 %v781_v52, %v377_v24  ;;  %v422_v33 = vmul.f32 %v787_v57, %v377_v24  ;;  %v453_v52 = vadd.f32 %v683_v29, %v452_v36 }
  0x78   : > { %v382_v15 = vmul.f32 %v783_v55, %v378_v27  ;;  %v423_v34 = vmul.f32 %v789_v59, %v378_v27 }
  0x79   : > { %v383_v37 = vmul.f32 %v1164_v56, %v379_v30  ;;  %v401_v38 = vmul.f32 %v677_v6, %v381_v31  ;;  %v407_v39 = vadd.f32 %v381_v31, %v380_v18  ;;  %v424_v40 = vmul.f32 %v791_v62, %v379_v30 }
  0x7a   : > { %v402_v41 = vmul.f32 %v678_v19, %v382_v15  ;;  %v442_v42 = vmul.f32 %v681_v11, %v422_v33  ;;  %v443_v43 = vmul.f32 %v682_v25, %v423_v34  ;;  %v448_v44 = vadd.f32 %v422_v33, %v421_v22 }
  0x7b   : > { %v403_v45 = vmul.f32 %v679_v14, %v383_v37  ;;  %v404_v46 = vadd.f32 %v401_v38, %v400_v32  ;;  %v408_v47 = vadd.f32 %v407_v39, %v382_v15  ;;  %v444_v49 = vmul.f32 %v683_v29, %v424_v40 }
  0x7c   : > { %v445_v50 = vadd.f32 %v442_v42, %v441_v35  ;;  %v449_v51 = vadd.f32 %v448_v44, %v423_v34 }
  0x7d   : > { %v405_v53 = vadd.f32 %v404_v46, %v402_v41  ;;  %v409_v54 = vadd.f32 %v408_v47, %v383_v37 }
  0x7e   : > { %v446_v55 = vadd.f32 %v445_v50, %v443_v43  ;;  %v450_v56 = vadd.f32 %v449_v51, %v424_v40 }
  0x7f   : > { %v406_v57 = vadd.f32 %v405_v53, %v403_v45  ;;  %v417_v58 = vadd.f32 %v412_v48, %v409_v54 }
  0x80   : > { %v447_v59 = vadd.f32 %v446_v55, %v444_v49  ;;  %v460_v60 = vadd.f32 %v453_v52, %v450_v56 }
  0x81   : > { %v418_v61 = vsub.f32 %v417_v58, %v406_v57  ;;  %415 = vst [vmem:[%s265_s5] sm:$0xff] %v406_v57 }
  0x82   : > { %v461_v62 = vsub.f32 %v460_v60, %v447_v59  ;;  %685 = vst [vmem:[%s265_s5 + $0x8] sm:$0xff] %v447_v59 }
  0x83   : > { %420 = vst [vmem:[%s1211_s15] sm:$0xff] %v418_v61 }
  0x84   : > { %869 = shalt.err (!%p866_p7)
}
  0x85   : > { %s870_s30 = scalar_lea.hbm %s1205_s19, 256  ;;  %s874_s5 = scalar_lea.hbm %s1298_s2, 512 }
  0x86   : > { %p871_p1 = scmp.ne.s32.totalorder %s1205_s19, %s870_s30  ;;  %p875_p3 = scmp.lt.s32.totalorder %s1205_s19, %s1298_s2 }
  0x87   : > { %p876_p8 = scmp.lt.s32.totalorder %s874_s5, %s870_s30 }
  0x88   : > { %p872_p10 = pnand %p871_p1, %p1052_p9 }
  0x89   : > { %p877_p0 = por %p876_p8, %p875_p3 }
  0x8a   : > { %p873_p13 = pneg %p872_p10 }
  0x8c   : > { %p878_p2 = pnand %p877_p0, %p873_p13 }
  0x8e   : > { %881 = shalt.err (!%p878_p2)
}
  0x8f   : > { %s978_s6 = smov 128   ;;  %s979_s8 = smov 8   ;;  %687 = vst [vmem:[%s1211_s15 + $0x8] sm:$0xff] %v461_v62 }
  0x90   : > { %703 = dma.vmem_to_hbm [thread:$0]  (%p1052_p9), %s1207_s7, 256, %s1205_s19, %s465_s22, %s978_s6, %s978_s6, %s979_s8  }
  0x91   : > { %s470_s23 = scalar_lea.sflag [#allocation9], %s1109_s28  ;;  %s882_s29 = scalar_lea.vmem %s1219_s21, 256 }
  0x92   : > { %p883_p5 = scmp.ne.s32.totalorder %s1219_s21, %s882_s29  ;;  %s980_s0 = smov [#allocation8]  }
  0x93   : > { %s886_s9 = sshll.u32 %s980_s0, 4  ;;  %s887_s9 = int_to_ptr.vmem [resolvable:$false] %s886_s9 }
  0x94   : > { %p884_p6 = pnand %p883_p5, %p1052_p9  ;;  %s888_s30 = scalar_lea.vmem %s887_s9, 512 }
  0x95   : > { %p889_p7 = scmp.lt.s32.totalorder %s1219_s21, %s887_s9  ;;  %p890_p1 = scmp.lt.s32.totalorder %s888_s30, %s882_s29 }
  0x96   : > { %p885_p4 = pneg %p884_p6 }
  0x97   : > { %p891_p10 = por %p890_p1, %p889_p7 }
  0x99   : > { %p892_p13 = pnand %p891_p10, %p885_p4 }
  0x9b   : > { %895 = shalt.err (!%p892_p13)
}
  0x9c   : > { %s896_s7 = scalar_lea.hbm %s1217_s10, 256  ;;  %s900_s15 = scalar_lea.hbm %s1299_s3, 512 }
  0x9d   : > { %p897_p3 = scmp.ne.s32.totalorder %s1217_s10, %s896_s7  ;;  %p901_p2 = scmp.lt.s32.totalorder %s1217_s10, %s1299_s3 }
  0x9e   : > { %p902_p5 = scmp.lt.s32.totalorder %s900_s15, %s896_s7 }
  0x9f   : > { %p898_p8 = pnand %p897_p3, %p1052_p9 }
  0xa0   : > { %p903_p6 = por %p902_p5, %p901_p2 }
  0xa1   : > { %p899_p0 = pneg %p898_p8 }
  0xa3   : > { %p904_p4 = pnand %p903_p6, %p899_p0 }
  0xa5   : > { %907 = shalt.err (!%p904_p4)
}
  0xa6   : > { %704 = dma.vmem_to_hbm [thread:$0]  (%p1052_p9), %s1219_s21, 256, %s1217_s10, %s470_s23, %s978_s6, %s978_s6, %s979_s8  }
  0xa7 PF: > { %s518_s4 = sand.u32 1, %s950_s12   ;;  %p715_p7 = pnand %p657_p12, %p1059_p11 }
  0xa8   : > { %s519_s5 = scalar_lea.sflag [#allocation4], %s518_s4 }
  0xa9   : > { %p716_p1 = pneg %p715_p7 }
  0xab   : > { %941 = dma.done.wait (%p716_p1), %s519_s5, 256  }
  0xac   : > { %943 = vsyncadd (%p716_p1), %s519_s5, 4294967040  ;;  %s528_s11 = scalar_lea.sflag [#allocation9], %s518_s4 }
  0xad   : > { %945 = dma.done.wait (%p716_p1), %s528_s11, 256  }
  0xae   : > { %947 = vsyncadd (%p716_p1), %s528_s11, 4294967040  ;;  %s26_s17 = sadd.s32 1, %s970_s17   ;;  %s1310_s12 = smov %s954_s13 }
  0xaf   : > { %p23_p10 = scmp.ge.s32.totalorder %s26_s17, 4   ;;  %s1311_s13 = smov %s958_s14 }
  0xb0   : > { %s1312_s14 = smov %s1057_s26  ;;  %s1313_s15 = smov %s966_s16 }
  0xb1   : > { %s1314_s16 = smov %s1316_s20  ;;  %25 = sbr.rel (!%p23_p10) target bundleno = 12 (0xc), region = 110 }
  0xb6   :  { %533 = vsyncpa [#allocation3], 1 }
  0xb7   :  { %535 = vsyncpa [#allocation3 + $0x1], 1 }
  0xb8   :  { %536 = vsyncpa [#allocation6], 1 }
  0xb9   :  { %538 = vsyncpa [#allocation6 + $0x1], 1 }
  0xba   :  { %539 = vsyncpa [#allocation4], 1 }
  0xbb   :  { %541 = vsyncpa [#allocation4 + $0x1], 1 }
  0xbc   :  { %542 = vsyncpa [#allocation9], 1 }
  0xbd   :  { %544 = vsyncpa [#allocation9 + $0x1], 1 }

</bundles_post_ra>
